<compile_context>
chip_gen: v7x
topology: tpu7x:2x2x1
jax: 0.10.0
libtpu: 0.0.40
codegen_flags: <defaults>
</compile_context>

<pallas_src>
import jax
import jax.numpy as jnp
from jax import lax
from jax.experimental import pallas as pl
from jax.experimental.pallas import tpu as pltpu

MAX_BATCH_SIZE = 64
_HALO = 128  # halo width (lanes) fetched from the start of the next time tile


def _round_up(x, m):
    return ((x + m - 1) // m) * m


def _pick_time_tile(t_out, cin, couts, max_tile):
    """Largest 128-multiple time tile whose double-buffered working set stays well
    inside the scoped VMEM limit (re-derived per call; v7x 64 MiB safe)."""
    t = min(_round_up(max_tile, 128), _round_up(t_out, 128))

    def vmem_bytes(tt):
        inp = 2 * (cin * tt + cin * _HALO) * 4        # x tile + halo, double buffered
        out = sum(2 * c * tt * 4 for c in couts)      # output tiles, double buffered
        acc = sum(c * tt * 4 for c in couts)          # f32 accumulators
        return inp + out + acc

    while t > 128 and vmem_bytes(t) > 10 * 1024 * 1024:
        t -= 128
    return t


def _make_fused_conv_kernel(n_branches, taps, starts, t_tile):
    def kernel(*refs):
        x_ref, halo_ref = refs[0], refs[1]
        w_refs = refs[2:2 + n_branches]
        b_refs = refs[2 + n_branches:2 + 2 * n_branches]
        o_refs = refs[2 + 2 * n_branches:]
        # (Cin, t_tile + _HALO): this tile of x is DMA'd from HBM exactly once per
        # grid step and reused by every branch below.
        xs = jnp.concatenate([x_ref[0], halo_ref[0]], axis=-1)
        for i in range(n_branches):
            k_taps, start = taps[i], starts[i]
            w_ref, b_ref, o_ref = w_refs[i], b_refs[i], o_refs[i]
            # Tap 0 initializes the accumulator (no zero-init pass over the tile).
            acc = jnp.dot(w_ref[0], xs[:, start:start + t_tile],
                          preferred_element_type=jnp.float32)
            for k in range(1, k_taps):
                acc = acc + jnp.dot(w_ref[k], xs[:, start + k:start + k + t_tile],
                                    preferred_element_type=jnp.float32)
            # NCT output: time sits on the lane axis -> lane-dense, unmasked stores.
            o_ref[0] = (acc + b_ref[...]).astype(o_ref.dtype)
    return kernel


def fused_conv1d_branches(x, branches, *, max_time_tile=1024):
    """Apply several stride-1 Conv1d branches to the SAME input in one pallas_call.

    x:        (B, Cin, T) float32, NCT (PyTorch Conv1d layout)
    branches: objects with .weight (Cout, Cin, K), .bias (Cout,), .padding (int)
    Returns a list of (B, Cout_i, T_out) arrays (all T_out must be equal).
    """
    B, Cin, T = x.shape
    n = len(branches)
    taps = [int(br.weight.shape[2]) for br in branches]
    pads = [int(br.padding) for br in branches]
    couts = [int(br.weight.shape[0]) for br in branches]
    for br in branches:
        assert int(br.weight.shape[1]) == Cin, "all branches must share in_channels"

    t_outs = [T + 2 * p - (k - 1) for p, k in zip(pads, taps)]
    assert len(set(t_outs)) == 1, "fused branches must produce equal output lengths"
    t_out = t_outs[0]
    assert t_out > 0, "non-positive conv output length"

    p_max = max(pads)
    starts = [p_max - p for p in pads]
    assert all(s + k - 1 <= _HALO for s, k in zip(starts, taps)), \
        "kernel size + padding skew exceeds the 128-lane halo"
    # TODO(synk): support halos wider than 128 lanes (very large kernels/delay skew).

    t_tile = _pick_time_tile(t_out, Cin, couts, max_time_tile)
    n_t = pl.cdiv(t_out, t_tile)
    slab_len = n_t * t_tile + _HALO

    # Single shared padded slab, built ONCE for all branches of the group: the left
    # zeros give each branch its conv padding via a per-branch lane offset, the tail
    # zeros cover tile rounding + halo.  Layout stays NCT -> no transposes anywhere.
    slab = jnp.pad(x, ((0, 0), (0, 0), (p_max, slab_len - p_max - T)))

    weights = [jnp.transpose(br.weight, (2, 0, 1)) for br in branches]  # (K, Cout, Cin)
    biases = [br.bias.reshape(-1, 1) for br in branches]                # (Cout, 1)

    in_specs = [
        # main tile of the slab
        pl.BlockSpec((1, Cin, t_tile), lambda b, t: (b, 0, t)),
        # 128-lane halo = start of the next tile (same array, second spec)
        pl.BlockSpec((1, Cin, _HALO),
                     lambda b, t: (b, 0, (t + 1) * (t_tile // _HALO))),
    ]
    for i in range(n):
        in_specs.append(pl.BlockSpec((taps[i], couts[i], Cin),
                                     lambda b, t: (0, 0, 0)))
    for i in range(n):
        in_specs.append(pl.BlockSpec((couts[i], 1), lambda b, t: (0, 0)))

    out_specs = [pl.BlockSpec((1, couts[i], t_tile), lambda b, t: (b, 0, t))
                 for i in range(n)]
    out_shape = [jax.ShapeDtypeStruct((B, couts[i], n_t * t_tile), x.dtype)
                 for i in range(n)]

    outs = pl.pallas_call(
        _make_fused_conv_kernel(n, taps, starts, t_tile),
        grid=(B, n_t),
        in_specs=in_specs,
        out_specs=out_specs,
        out_shape=out_shape,
        compiler_params=pltpu.CompilerParams(
            dimension_semantics=("parallel", "parallel"),
            vmem_limit_bytes=32 * 1024 * 1024),
    )(slab, slab, *weights, *biases)

    if n_t * t_tile != t_out:
        outs = [o[:, :, :t_out] for o in outs]
    return list(outs)


class CachedPadding1d:
    """Cached padding: prepend the cached tail of the previous call (zeros on the
    first call); with crop=True, crop back to the original length (pure delay)."""

    def __init__(self, padding, crop=False):
        self.padding = int(padding)
        self.crop = crop
        self.initialized = 0
        self.pad = None  # host-side JAX array state (stands in for register_buffer)

    def init_cache(self, x):
        _, c, _ = x.shape
        self.pad = jnp.zeros((MAX_BATCH_SIZE, c, self.padding), dtype=x.dtype)
        self.initialized += 1

    def __call__(self, x):
        if not self.initialized:
            self.init_cache(x)
        if self.padding:
            b = x.shape[0]
            xc = jnp.concatenate([self.pad[:b], x], axis=-1)
            self.pad = self.pad.at[:b].set(xc[..., -self.padding:])
            if self.crop:
                return xc[..., :-self.padding]
            return xc
        return x


class Conv1dBranch:
    """Deterministic stride-1 Conv1d branch backed by the fused Pallas kernel."""
    # TODO(synk): stride/dilation/groups other than 1 are not supported here.

    def __init__(self, key, in_channels, out_channels, kernel_size, padding=0,
                 cumulative_delay=0):
        kw, kb = jax.random.split(key)
        fan_in = in_channels * kernel_size
        bound = 1.0 / float(fan_in) ** 0.5
        self.weight = jax.random.uniform(
            kw, (out_channels, in_channels, kernel_size),
            minval=-bound, maxval=bound, dtype=jnp.float32)
        self.bias = jax.random.uniform(
            kb, (out_channels,), minval=-bound, maxval=bound, dtype=jnp.float32)
        self.padding = int(padding)
        self.cumulative_delay = int(cumulative_delay)

    def __call__(self, x):
        return fused_conv1d_branches(x, [self])[0]


class AlignBranches:
    """JAX/Pallas port of cached_conv.convs.AlignBranches.

    Each branch's input is delayed (CachedPadding1d, crop=True) so all branch
    outputs are time-aligned to the slowest branch.  Branches whose aligned inputs
    coincide are fused into a single pallas_call, so each x tile is read from HBM
    once per group.
    """

    def __init__(self, *branches, delays=None, cumulative_delay=0, stride=1):
        self.branches = list(branches)
        if delays is None:
            delays = [b.cumulative_delay for b in self.branches]
        max_delay = max(delays)
        self.paddings = [CachedPadding1d(max_delay - d, crop=True) for d in delays]
        self.cumulative_delay = int(cumulative_delay * stride) + max_delay

    def __call__(self, x):
        T = x.shape[-1]
        # Apply the cached alignment padding once per branch (a pure pass-through
        # when the branch already has the maximum delay).
        delayed = [pad(x) for pad in self.paddings]

        # Group branches sharing the same aligned input & output length; within a
        # group the delayed inputs are identical by construction (same cache
        # history, same x), so one fused pallas_call serves the whole group.
        groups = {}
        for i, br in enumerate(self.branches):
            k = int(br.weight.shape[2])
            t_out = T + 2 * br.padding - (k - 1)
            groups.setdefault((self.paddings[i].padding, t_out), []).append(i)

        outs = [None] * len(self.branches)
        for idxs in groups.values():
            group_out = fused_conv1d_branches(
                delayed[idxs[0]], [self.branches[i] for i in idxs])
            for i, o in zip(idxs, group_out):
                outs[i] = o
        return outs


# ----------------------------- references (pure JAX) ---------------------------

def _ref_conv1d(x_nct, weight, bias, padding):
    out = lax.conv_general_dilated(
        x_nct, weight, window_strides=(1,), padding=[(padding, padding)],
        dimension_numbers=("NCH", "OIH", "NCH"),
        precision=lax.Precision.HIGHEST)
    return out + bias[None, :, None]


def _ref_delay(x, cache):
    d = cache.shape[-1]
    if d == 0:
        return x
    return jnp.concatenate([cache, x], axis=-1)[..., :x.shape[-1]]


if __name__ == "__main__":
    key = jax.random.PRNGKey(0)
    k_x1, k_x2, k_b0, k_b1, k_b2 = jax.random.split(key, 5)

    B, Cin, T, Cout = 2, 4, 16, 8
    x1 = jax.random.normal(k_x1, (B, Cin, T), dtype=jnp.float32)
    x2 = jax.random.normal(k_x2, (B, Cin, T), dtype=jnp.float32)

    # Three branches: pointwise conv, k=3 "same" conv (both delay 0), and a k=3
    # "same" conv reporting cumulative_delay=2 -> the first two branches get an
    # alignment delay of 2 samples via CachedPadding1d.
    branch0 = Conv1dBranch(k_b0, Cin, Cout, kernel_size=1, padding=0)
    branch1 = Conv1dBranch(k_b1, Cin, Cout, kernel_size=3, padding=1)
    branch2 = Conv1dBranch(k_b2, Cin, Cout, kernel_size=3, padding=1,
                           cumulative_delay=2)
    model = AlignBranches(branch0, branch1, branch2)
    assert model.cumulative_delay == 2

    # --- first forward (caches start at zero) ---
    outs1 = model(x1)
    outs1 = [jax.block_until_ready(o) for o in outs1]

    zeros2 = jnp.zeros((B, Cin, 2), jnp.float32)
    d01_1 = _ref_delay(x1, zeros2)
    refs1 = [
        _ref_conv1d(d01_1, branch0.weight, branch0.bias, branch0.padding),
        _ref_conv1d(d01_1, branch1.weight, branch1.bias, branch1.padding),
        _ref_conv1d(x1, branch2.weight, branch2.bias, branch2.padding),
    ]
    for o, r in zip(outs1, refs1):
        assert o.shape == (B, Cout, T)
        assert jnp.allclose(o, r, atol=1e-5, rtol=1e-5)

    # --- second forward (exercises the cached-padding state) ---
    outs2 = model(x2)
    outs2 = [jax.block_until_ready(o) for o in outs2]

    cache_after_1 = x1[..., -2:]
    d01_2 = _ref_delay(x2, cache_after_1)
    refs2 = [
        _ref_conv1d(d01_2, branch0.weight, branch0.bias, branch0.padding),
        _ref_conv1d(d01_2, branch1.weight, branch1.bias, branch1.padding),
        _ref_conv1d(x2, branch2.weight, branch2.bias, branch2.padding),
    ]
    for o, r in zip(outs2, refs2):
        assert jnp.allclose(o, r, atol=1e-5, rtol=1e-5)

    print("KERNEL_OK")
</pallas_src>

<mosaic_0001>
module attributes {stable_mosaic.version = 11 : i64} {
  func.func @kernel(%arg0: i32, %arg1: i32, %arg2: memref<1x4x128xf32, #tpu.memory_space<vmem>>, %arg3: memref<1x4x128xf32, #tpu.memory_space<vmem>>, %arg4: memref<1x8x4xf32, #tpu.memory_space<vmem>>, %arg5: memref<3x8x4xf32, #tpu.memory_space<vmem>>, %arg6: memref<8x1xf32, #tpu.memory_space<vmem>>, %arg7: memref<8x1xf32, #tpu.memory_space<vmem>>, %arg8: memref<1x8x128xf32, #tpu.memory_space<vmem>>, %arg9: memref<1x8x128xf32, #tpu.memory_space<vmem>>) attributes {dimension_semantics = [#tpu.dimension_semantics<parallel>, #tpu.dimension_semantics<parallel>], iteration_bounds = array<i64: 2, 1>, scalar_prefetch = 0 : i64, scratch_operands = 0 : i64, tpu.core_type = #tpu.core_type<tc>, window_params = [{transform_indices = @transform_0, window_bounds = array<i64: 1, 4, 128>}, {transform_indices = @transform_1, window_bounds = array<i64: 1, 4, 128>}, {pipeline_mode = #tpu.pipeline_mode<synchronous>, transform_indices = @transform_2, window_bounds = array<i64: 1, 8, 4>}, {pipeline_mode = #tpu.pipeline_mode<synchronous>, transform_indices = @transform_3, window_bounds = array<i64: 3, 8, 4>}, {pipeline_mode = #tpu.pipeline_mode<synchronous>, transform_indices = @transform_4, window_bounds = array<i64: 8, 1>}, {pipeline_mode = #tpu.pipeline_mode<synchronous>, transform_indices = @transform_5, window_bounds = array<i64: 8, 1>}, {transform_indices = @transform_6, window_bounds = array<i64: 1, 8, 128>}, {transform_indices = @transform_7, window_bounds = array<i64: 1, 8, 128>}]} {
    %c0 = arith.constant 0 : index
    %c0_0 = arith.constant 0 : index
    %c0_1 = arith.constant 0 : index
    %0 = vector.load %arg2[%c0, %c0_0, %c0_1] : memref<1x4x128xf32, #tpu.memory_space<vmem>>, vector<1x4x128xf32>
    %1 = vector.shape_cast %0 : vector<1x4x128xf32> to vector<4x128xf32>
    %c0_2 = arith.constant 0 : index
    %c0_3 = arith.constant 0 : index
    %c0_4 = arith.constant 0 : index
    %2 = vector.load %arg3[%c0_2, %c0_3, %c0_4] : memref<1x4x128xf32, #tpu.memory_space<vmem>>, vector<1x4x128xf32>
    %3 = vector.shape_cast %2 : vector<1x4x128xf32> to vector<4x128xf32>
    %4 = tpu.concatenate %1, %3 in 1 : vector<4x128xf32>, vector<4x128xf32> -> vector<4x256xf32>
    %c0_5 = arith.constant 0 : index
    %c0_6 = arith.constant 0 : index
    %c0_7 = arith.constant 0 : index
    %5 = vector.load %arg4[%c0_5, %c0_6, %c0_7] : memref<1x8x4xf32, #tpu.memory_space<vmem>>, vector<1x8x4xf32>
    %6 = vector.shape_cast %5 : vector<1x8x4xf32> to vector<8x4xf32>
    %7 = vector.extract_strided_slice %4 {offsets = [0, 1], sizes = [4, 128], strides = [1, 1]} : vector<4x256xf32> to vector<4x128xf32>
    %cst = arith.constant dense<0.000000e+00> : vector<8x128xf32>
    %8 = tpu.matmul %6, %7, %cst {dimension_numbers = #tpu.dot_dimension_numbers<[1], [0], [0], [1], [0, 0, 1, 1], [], []>} : vector<8x4xf32>, vector<4x128xf32>, vector<8x128xf32> -> vector<8x128xf32>
    %c0_8 = arith.constant 0 : index
    %c0_9 = arith.constant 0 : index
    %9 = vector.load %arg6[%c0_8, %c0_9] : memref<8x1xf32, #tpu.memory_space<vmem>>, vector<8x1xf32>
    %10 = vector.broadcast %9 : vector<8x1xf32> to vector<8x128xf32>
    %11 = arith.addf %8, %10 : vector<8x128xf32>
    %c0_10 = arith.constant 0 : index
    %c0_11 = arith.constant 0 : index
    %c0_12 = arith.constant 0 : index
    %12 = vector.load %arg8[%c0_10, %c0_11, %c0_12] : memref<1x8x128xf32, #tpu.memory_space<vmem>>, vector<1x8x128xf32>
    %13 = vector.shape_cast %12 : vector<1x8x128xf32> to vector<8x128xf32>
    %14 = vector.shape_cast %11 : vector<8x128xf32> to vector<1x8x128xf32>
    tpu.vector_store %arg8[%c0_10, %c0_11, %c0_12], %14 {strides = array<i32>} : memref<1x8x128xf32, #tpu.memory_space<vmem>>, vector<1x8x128xf32>,
    %c0_13 = arith.constant 0 : index
    %c0_14 = arith.constant 0 : index
    %c0_15 = arith.constant 0 : index
    %15 = vector.load %arg5[%c0_13, %c0_14, %c0_15] : memref<3x8x4xf32, #tpu.memory_space<vmem>>, vector<1x8x4xf32>
    %16 = vector.shape_cast %15 : vector<1x8x4xf32> to vector<8x4xf32>
    %17 = vector.extract_strided_slice %4 {offsets = [0, 0], sizes = [4, 128], strides = [1, 1]} : vector<4x256xf32> to vector<4x128xf32>
    %cst_16 = arith.constant dense<0.000000e+00> : vector<8x128xf32>
    %18 = tpu.matmul %16, %17, %cst_16 {dimension_numbers = #tpu.dot_dimension_numbers<[1], [0], [0], [1], [0, 0, 1, 1], [], []>} : vector<8x4xf32>, vector<4x128xf32>, vector<8x128xf32> -> vector<8x128xf32>
    %c1 = arith.constant 1 : index
    %c0_17 = arith.constant 0 : index
    %c0_18 = arith.constant 0 : index
    %19 = vector.load %arg5[%c1, %c0_17, %c0_18] : memref<3x8x4xf32, #tpu.memory_space<vmem>>, vector<1x8x4xf32>
    %20 = vector.shape_cast %19 : vector<1x8x4xf32> to vector<8x4xf32>
    %21 = vector.extract_strided_slice %4 {offsets = [0, 1], sizes = [4, 128], strides = [1, 1]} : vector<4x256xf32> to vector<4x128xf32>
    %cst_19 = arith.constant dense<0.000000e+00> : vector<8x128xf32>
    %22 = tpu.matmul %20, %21, %cst_19 {dimension_numbers = #tpu.dot_dimension_numbers<[1], [0], [0], [1], [0, 0, 1, 1], [], []>} : vector<8x4xf32>, vector<4x128xf32>, vector<8x128xf32> -> vector<8x128xf32>
    %23 = arith.addf %18, %22 : vector<8x128xf32>
    %c2 = arith.constant 2 : index
    %c0_20 = arith.constant 0 : index
    %c0_21 = arith.constant 0 : index
    %24 = vector.load %arg5[%c2, %c0_20, %c0_21] : memref<3x8x4xf32, #tpu.memory_space<vmem>>, vector<1x8x4xf32>
    %25 = vector.shape_cast %24 : vector<1x8x4xf32> to vector<8x4xf32>
    %26 = vector.extract_strided_slice %4 {offsets = [0, 2], sizes = [4, 128], strides = [1, 1]} : vector<4x256xf32> to vector<4x128xf32>
    %cst_22 = arith.constant dense<0.000000e+00> : vector<8x128xf32>
    %27 = tpu.matmul %25, %26, %cst_22 {dimension_numbers = #tpu.dot_dimension_numbers<[1], [0], [0], [1], [0, 0, 1, 1], [], []>} : vector<8x4xf32>, vector<4x128xf32>, vector<8x128xf32> -> vector<8x128xf32>
    %28 = arith.addf %23, %27 : vector<8x128xf32>
    %c0_23 = arith.constant 0 : index
    %c0_24 = arith.constant 0 : index
    %29 = vector.load %arg7[%c0_23, %c0_24] : memref<8x1xf32, #tpu.memory_space<vmem>>, vector<8x1xf32>
    %30 = vector.broadcast %29 : vector<8x1xf32> to vector<8x128xf32>
    %31 = arith.addf %28, %30 : vector<8x128xf32>
    %c0_25 = arith.constant 0 : index
    %c0_26 = arith.constant 0 : index
    %c0_27 = arith.constant 0 : index
    %32 = vector.load %arg9[%c0_25, %c0_26, %c0_27] : memref<1x8x128xf32, #tpu.memory_space<vmem>>, vector<1x8x128xf32>
    %33 = vector.shape_cast %32 : vector<1x8x128xf32> to vector<8x128xf32>
    %34 = vector.shape_cast %31 : vector<8x128xf32> to vector<1x8x128xf32>
    tpu.vector_store %arg9[%c0_25, %c0_26, %c0_27], %34 {strides = array<i32>} : memref<1x8x128xf32, #tpu.memory_space<vmem>>, vector<1x8x128xf32>,
    return
  }
  func.func @transform_0(%arg0: i32, %arg1: i32) -> (i32, i32, i32) {
    %c0_i32 = arith.constant 0 : i32
    %c0_i32_0 = arith.constant 0 : i32
    return %arg0, %c0_i32, %arg1 : i32, i32, i32
  }
  func.func @transform_1(%arg0: i32, %arg1: i32) -> (i32, i32, i32) {
    %c1_i32 = arith.constant 1 : i32
    %0 = arith.addi %arg1, %c1_i32 : i32
    %c1_i32_0 = arith.constant 1 : i32
    %1 = arith.muli %0, %c1_i32_0 : i32
    %c0_i32 = arith.constant 0 : i32
    %c0_i32_1 = arith.constant 0 : i32
    return %arg0, %c0_i32, %1 : i32, i32, i32
  }
  func.func @transform_2(%arg0: i32, %arg1: i32) -> (i32, i32, i32) {
    %c0_i32 = arith.constant 0 : i32
    %c0_i32_0 = arith.constant 0 : i32
    %c0_i32_1 = arith.constant 0 : i32
    %c0_i32_2 = arith.constant 0 : i32
    return %c0_i32, %c0_i32_0, %c0_i32_1 : i32, i32, i32
  }
  func.func @transform_3(%arg0: i32, %arg1: i32) -> (i32, i32, i32) {
    %c0_i32 = arith.constant 0 : i32
    %c0_i32_0 = arith.constant 0 : i32
    %c0_i32_1 = arith.constant 0 : i32
    %c0_i32_2 = arith.constant 0 : i32
    return %c0_i32, %c0_i32_0, %c0_i32_1 : i32, i32, i32
  }
  func.func @transform_4(%arg0: i32, %arg1: i32) -> (i32, i32) {
    %c0_i32 = arith.constant 0 : i32
    %c0_i32_0 = arith.constant 0 : i32
    %c0_i32_1 = arith.constant 0 : i32
    return %c0_i32, %c0_i32_0 : i32, i32
  }
  func.func @transform_5(%arg0: i32, %arg1: i32) -> (i32, i32) {
    %c0_i32 = arith.constant 0 : i32
    %c0_i32_0 = arith.constant 0 : i32
    %c0_i32_1 = arith.constant 0 : i32
    return %c0_i32, %c0_i32_0 : i32, i32
  }
  func.func @transform_6(%arg0: i32, %arg1: i32) -> (i32, i32, i32) {
    %c0_i32 = arith.constant 0 : i32
    %c0_i32_0 = arith.constant 0 : i32
    return %arg0, %c0_i32, %arg1 : i32, i32, i32
  }
  func.func @transform_7(%arg0: i32, %arg1: i32) -> (i32, i32, i32) {
    %c0_i32 = arith.constant 0 : i32
    %c0_i32_0 = arith.constant 0 : i32
    return %arg0, %c0_i32, %arg1 : i32, i32, i32
  }
}

</mosaic_0001>

<bundles_post_ra>
// kernel: tpu_custom_call.1
= control target key start
LH: loop header
LB: loop body
LE: loop exit
PB: predicated region body
PF: predicated region fallthrough
CT: control target
= control target key end

     0   :  { %13 = vsyncpa [#allocation3], 0  ;;  %s1321_s0 = inlined_call_operand.vmem [shape: f32[2,4,256], index: 0, kind: input, shape index: {}]   ;;  %s1322_s1 = inlined_call_operand.vmem [shape: f32[2,4,256], index: 1, kind: input, shape index: {}]   ;;  %s1323_s2 = inlined_call_operand.vmem [shape: f32[1,8,4], index: 2, kind: input, shape index: {}]   ;;  %s1324_s3 = inlined_call_operand.vmem [shape: f32[3,8,4], index: 3, kind: input, shape index: {}]   ;;  %s1325_s4 = inlined_call_operand.vmem [shape: f32[8,1], index: 4, kind: input, shape index: {}]   ;;  %s1326_s5 = inlined_call_operand.vmem [shape: f32[8,1], index: 5, kind: input, shape index: {}]   ;;  %s1327_s6 = inlined_call_operand.hbm [shape: f32[2,8,128], index: 6, kind: output, shape index: {0}]   ;;  %s1328_s7 = inlined_call_operand.hbm [shape: f32[2,8,128], index: 7, kind: output, shape index: {1}]  }
   0x1   :  { %15 = vsyncpa [#allocation3 + $0x1], 0 }
   0x2   :  { %16 = vsyncpa [#allocation5], 0 }
   0x3   :  { %18 = vsyncpa [#allocation5 + $0x1], 0  ;;  %s1135_s24 = smov 0   ;;  %s1137_s25 = smov 0  }
   0x4   :  { %s1139_s26 = smov 0   ;;  %s1141_s27 = smov 0  }
   0x5   :  { %s1143_s28 = smov 0   ;;  %s1145_s29 = smov 0  }
   0x6 LB: > { %s850_s30 = sadd.s32 4294967295, %s1086_s29   ;;  %s851_s8 = sadd.s32 4294967294, %s1086_s29   ;;  %s1086_s29 = sphi %s1145_s29, %s24_s29   ;;  %s1082_s28 = sphi %s1143_s28, %s1337_s28   ;;  %s1078_s27 = sphi %s1141_s27, %s1336_s27   ;;  %s1074_s26 = sphi %s1139_s26, %s1335_s26   ;;  %s1070_s25 = sphi %s1137_s25, %s1334_s25   ;;  %s1066_s24 = sphi %s1135_s24, %s1333_s24  }
   0x7   : > { %s36_s9 = sadd.s32 1, %s1082_s28  ;;  %s187_s10 = sadd.s32 1, %s1074_s26 }
   0x8   : > { %p38_p0 = scmp.ge.s32.totalorder %s36_s9, 2  ;;  %p197_p1 = scmp.ne.s32.totalorder %s1074_s26, %s1070_s25 }
   0x9   : > { %p198_p2 = scmp.eq.s32.totalorder %s850_s30, 1  ;;  %p203_p3 = scmp.ne.s32.totalorder %s1070_s25, %s1066_s24 }
   0xa   : > { %s1339_s9 = smov (%p38_p0, %s36_s9), 0  ;;  %p204_p5 = scmp.eq.s32.totalorder %s851_s8, 1 }
   0xb   : > { %p1175_p4 = por %p198_p2, %p197_p1  ;;  %s182_s12 = ssub.s32 %s1082_s28, %s1339_s9 }
   0xc   : > { %p854_p6 = scmp.ge.s32.totalorder %s1086_s29, 1  ;;  %p185_p7 = scmp.eq.s32.totalorder %s182_s12, 0 }
   0xd   : > { %p1182_p8 = por %p204_p5, %p203_p3  ;;  %p286_p9 = scmp.lt.s32.totalorder %s1086_s29, 3 }
   0xe   : > { %s1188_s14 = scalar_select %p185_p7, %s1074_s26, %s187_s10  }
   0xf   : > { %p287_p10 = pnand %p854_p6, %p286_p9 }
  0x10   : > { %p335_p11 = scmp.lt.s32.totalorder (!%p287_p10), %s1078_s27, 1  ;;  %v1088_v0 = vmov (!%p287_p10), 0.0   ;;  %vm1089_vm0 = vmmov (!%p287_p10), 0   ;;  %v1090_v2 = vmov (!%p287_p10), 0   ;;  %s1091_s30 = smov (!%p287_p10), 126   ;;  %v356_v4 = vld [vmem:[%s1325_s4] sm:$0xff] (!%p287_p10) }
  0x11   : > { %290 = sbr.rel (%p287_p10) target bundleno = 404 (0x194), region = 44  ;;  %889 = vmatprep.subr.mxu0 (!%p287_p10), %v1088_v0  ;;  %894 = vmatprep.subr.mxu1 (!%p287_p10), %v1088_v0  ;;  %s1092_s8 = smov (!%p287_p10), 127   ;;  %v683_v5 = vld [vmem:[%s1326_s5] sm:$0xff] (!%p287_p10)  ;;  %vm368_vm1 = vcmask (!%p287_p10), 1039360   ;;  %vm605_vm2 = vcmask (!%p287_p10), 1031168   ;;  %vm374_vm3 = vcmask (!%p287_p10), 1043456  }
  0x12   : > { %891 = vmatprep.mubr.msk.f32.mxu0 (!%p287_p10), %vm1089_vm0, %v1088_v0  ;;  %896 = vmatprep.mubr.msk.f32.mxu1 (!%p287_p10), %vm1089_vm0, %v1088_v0  ;;  %v355_v10 = vld [vmem:[%s1323_s2] sm:$0xff] (!%p287_p10)  ;;  %vm370_vm4 = vcmask (!%p287_p10), 31744   ;;  %v863_v12 = vld [vmem:[%s1324_s3 + $0x8] sm:$0xff] (!%p287_p10)  ;;  %v868_v15 = vld [vmem:[%s1324_s3 + $0x10] sm:$0xff] (!%p287_p10)  ;;  %s1329_s12 = sshll.u32 (!%p287_p10), %s1078_s27, 7  ;;  %s1093_s22 = smov (!%p287_p10), [#allocation2]  }
  0x13   : > { %974 = vset.pattern.permute.xlu0 (!%p287_p10), %v1090_v2  ;;  %975 = vset.pattern.permute.xlu1 (!%p287_p10), %v1090_v2  ;;  %v448_v14 = vld [vmem:[%s1324_s3] sm:$0xff] (!%p287_p10) }
  0x18   : > { %s336_s15 = scalar_select %p335_p11, %s1078_s27, 1 }
  0x1a   : > { %s877_s16 = sshll.u32 %s336_s15, 3 }
  0x1b   : > { %s342_s19 = scalar_lea.vmem %s1321_s0, %s877_s16  ;;  %s879_s20 = sadd.s32 4, %s877_s16 }
  0x1c   : > { %v353_v1 = vld [vmem:[%s342_s19] sm:$0xf]  ;;  %s351_s23 = scalar_lea.vmem %s1322_s1, %s879_s20  ;;  %s1240_s19 = scalar_lea.hbm %s1327_s6, %s1329_s12 }
  0x1d   : > { %601 = vrot.lane.b32.xlu1 %v353_v1, %s1091_s30  ;;  %364 = vrot.lane.b32.xlu0 %v353_v1, %s1092_s8  ;;  %v354_v3 = vld [vmem:[%s351_s23] sm:$0xf]  ;;  %s980_s23 = sshll.u32 %s1093_s22, 4  ;;  %s981_s23 = int_to_ptr.vmem [resolvable:$false] %s980_s23 }
  0x21   : > { %603 = vrot.lane.b32.xlu1 %v354_v3, %s1091_s30  ;;  %366 = vrot.lane.b32.xlu0 %v354_v3, %s1092_s8  ;;  %s1229_s8 = sand.u32 1, %s1070_s25   ;;  %s982_s30 = scalar_lea.vmem %s981_s23, 256 }
  0x22   : > { %s855_s10 = sshll.u32 %s1229_s8, 3  ;;  %s692_s20 = scalar_lea.sflag [#allocation3], %s1229_s8 }
  0x23   : > { %s327_s15 = scalar_lea.vmem [#allocation2], %s855_s10 }
  0x24   : > { %s711_s16 = sshll.u32 %s327_s15, 4  ;;  %s1242_s16 = int_to_ptr.vmem [resolvable:$true] %s711_s16 }
  0x25   : > { %359 = vperm.xlu0 %974, %v356_v4   ;;  %686 = vperm.xlu1 %975, %v683_v5   ;;  %s976_s21 = scalar_lea.vmem %s1242_s16, 128  ;;  %p983_p1 = scmp.lt.s32.totalorder %s1242_s16, %s981_s23 }
  0x26   : > { %p977_p12 = scmp.ne.s32.totalorder %s1242_s16, %s976_s21  ;;  %p984_p2 = scmp.lt.s32.totalorder %s982_s30, %s976_s21 }
  0x28   : > { %p978_p13 = pnand %p977_p12, %p1175_p4  ;;  %p985_p3 = por %p984_p2, %p983_p1 }
  0x2a   : > { %p979_p0 = pneg %p978_p13 }
  0x2c   : > { %p986_p5 = pnand %p985_p3, %p979_p0 }
  0x8f   : > { %v602_v6 = vpop.permute.xlu1 %601  ;;  %v365_v7 = vpop.permute.xlu0 %364 }
  0x93   : > { %v604_v8 = vpop.permute.xlu1 %603  ;;  %v367_v9 = vpop.permute.xlu0 %366 }
  0x94   : > { %v369_v11 = vsel %vm368_vm1, %v365_v7, %v367_v9  ;;  %v606_v13 = vsel %vm605_vm2, %v602_v6, %v604_v8 }
  0x95   : > { %890 = vmatpush3.msk.msra.mxu0 %vm374_vm3, %v369_v11  ;;  %895 = vmatpush3.msk.msra.mxu1 %vm374_vm3, %v369_v11 }
  0x96   : > { %892 = vmatmul.mubr.msk.f32.vlgmr.msra.gmra.mrb[0].mxu0 %vm370_vm4, %v355_v10  ;;  %899 = vmatprep.subr.mxu0 %v1088_v0 }
  0x97   : > { %904 = vmatprep.subr.mxu1 %v1088_v0  ;;  %897 = vmatmul.mubr.msk.f32.vlgmr.msra.gmra.mrb[0].mxu1 %vm370_vm4, %v863_v12 }
  0x98   : > { %900 = vmatpush3.msk.msra.mxu0 %vm374_vm3, %v353_v1  ;;  %905 = vmatpush3.msk.msra.mxu1 %vm374_vm3, %v606_v13 }
  0x99   : > { %901 = vmatprep.mubr.msk.f32.mxu0 %vm1089_vm0, %v1088_v0  ;;  %906 = vmatprep.mubr.msk.f32.mxu1 %vm1089_vm0, %v1088_v0 }
  0x9a   : > { %902 = vmatmul.mubr.msk.f32.vlgmr.msra.gmra.mrb[2].mxu0 %vm370_vm4, %v448_v14 }
  0x9b   : > { %907 = vmatmul.mubr.msk.f32.vlgmr.msra.gmra.mrb[2].mxu1 %vm370_vm4, %v868_v15 }
  0xa4   : > { %v360_v16 = vpop.permute.xlu0 %359 }
 0x169   : > { %v443_v17 = vpop.f32.mrb[0].mxu0 }
 0x16a   : > { %v893_v18 = vpop.f32.mrb[1].mxu0  ;;  %v444_v19 = vadd.f32 %v443_v17, %v360_v16  ;;  %v520_v20 = vpop.f32.mrb[0].mxu1 }
 0x16b   : > { %v898_v21 = vpop.f32.mrb[1].mxu1 }
 0x16c   : > { %447 = vst [vmem:[%s327_s15] sm:$0xff] %v444_v19 }
 0x16d   : > { %v595_v22 = vpop.f32.mrb[2].mxu0 }
 0x16e   : > { %989 = shalt.err (!%p986_p5)
}
 0x16f   : > { %s990_s15 = scalar_lea.hbm %s1240_s19, 128  ;;  %s994_s22 = scalar_lea.hbm %s1327_s6, 256 }
 0x170   : > { %p991_p6 = scmp.ne.s32.totalorder %s1240_s19, %s990_s15  ;;  %p995_p10 = scmp.lt.u32.totalorder %s1240_s19, %s1327_s6 }
 0x171   : > { %p996_p11 = scmp.lt.u32.totalorder %s994_s22, %s990_s15  ;;  %p998_p13 = scmp.lt.u32.totalorder %s990_s15, %s1240_s19 }
 0x172   : > { %p992_p7 = pnand %p991_p6, %p1175_p4 }
 0x173   : > { %p997_p12 = por %p996_p11, %p995_p10 }
 0x174   : > { %p993_p9 = pneg %p992_p7 }
 0x175   : > { %p999_p0 = por %p998_p13, %p997_p12 }
 0x177   : > { %p1000_p1 = pnand %p999_p0, %p993_p9 }
 0x179   : > { %1003 = shalt.err (!%p1000_p1)
}
 0x17a   : > { %909 = dma.vmem_to_hbm [thread:$0]  (%p1175_p4), %s1242_s16, 128, %s1240_s19, %s692_s20   ;;  %v596_v23 = vadd.f32 %v595_v22, %v520_v20  ;;  %v903_v24 = vpop.f32.mrb[3].mxu0  ;;  %v678_v25 = vpop.f32.mrb[2].mxu1 }
 0x17b   : > { %v908_v26 = vpop.f32.mrb[3].mxu1  ;;  %v687_v27 = vpop.permute.xlu1 %686  ;;  %s334_s12 = scalar_lea.vmem [#allocation4], %s855_s10  ;;  %s1332_s30 = sshll.u32 %s1078_s27, 7 }
 0x17c   : > { %s725_s21 = sshll.u32 %s334_s12, 4  ;;  %v682_v28 = vadd.f32 %v678_v25, %v596_v23  ;;  %s1273_s18 = scalar_lea.hbm %s1328_s7, %s1332_s30  ;;  %s1275_s21 = int_to_ptr.vmem [resolvable:$true] %s725_s21 }
 0x17d   : > { %s697_s16 = scalar_lea.sflag [#allocation5], %s1229_s8  ;;  %s1004_s19 = scalar_lea.vmem %s1275_s21, 128 }
 0x17e   : > { %v689_v29 = vadd.f32 %v687_v27, %v682_v28  ;;  %p1005_p2 = scmp.ne.s32.totalorder %s1275_s21, %s1004_s19  ;;  %s1094_s10 = smov [#allocation4]  }
 0x17f   : > { %s1008_s20 = sshll.u32 %s1094_s10, 4  ;;  %s1009_s20 = int_to_ptr.vmem [resolvable:$false] %s1008_s20 }
 0x180   : > { %690 = vst [vmem:[%s334_s12] sm:$0xff] %v689_v29  ;;  %p1006_p3 = pnand %p1005_p2, %p1175_p4  ;;  %s1010_s27 = scalar_lea.vmem %s1009_s20, 256 }
 0x181   : > { %p1011_p6 = scmp.lt.s32.totalorder %s1275_s21, %s1009_s20  ;;  %p1012_p7 = scmp.lt.s32.totalorder %s1010_s27, %s1004_s19 }
 0x182   : > { %p1007_p5 = pneg %p1006_p3 }
 0x183   : > { %p1013_p9 = por %p1012_p7, %p1011_p6 }
 0x185   : > { %p1014_p10 = pnand %p1013_p9, %p1007_p5 }
 0x187   : > { %1017 = shalt.err (!%p1014_p10)
}
 0x188   : > { %s1018_s8 = scalar_lea.hbm %s1273_s18, 128  ;;  %s1022_s12 = scalar_lea.hbm %s1328_s7, 256 }
 0x189   : > { %p1019_p11 = scmp.ne.s32.totalorder %s1273_s18, %s1018_s8  ;;  %p1023_p0 = scmp.lt.u32.totalorder %s1273_s18, %s1328_s7 }
 0x18a   : > { %p1024_p1 = scmp.lt.u32.totalorder %s1022_s12, %s1018_s8  ;;  %p1026_p3 = scmp.lt.u32.totalorder %s1018_s8, %s1273_s18 }
 0x18b   : > { %p1020_p12 = pnand %p1019_p11, %p1175_p4 }
 0x18c   : > { %p1025_p2 = por %p1024_p1, %p1023_p0 }
 0x18d   : > { %p1021_p13 = pneg %p1020_p12 }
 0x18e   : > { %p1027_p5 = por %p1026_p3, %p1025_p2 }
 0x190   : > { %p1028_p6 = pnand %p1027_p5, %p1021_p13 }
 0x192   : > { %1031 = shalt.err (!%p1028_p6)
}
 0x193   : > { %910 = dma.vmem_to_hbm [thread:$0]  (%p1175_p4), %s1275_s21, 128, %s1273_s18, %s697_s16  }
 0x194 PF: > { %p920_p7 = scmp.ge.s32.totalorder %s1086_s29, 2  ;;  %s737_s17 = sand.u32 1, %s1066_s24  }
 0x195   : > { %s738_s19 = scalar_lea.sflag [#allocation3], %s737_s17 }
 0x196   : > { %p914_p9 = pnand %p920_p7, %p1182_p8 }
 0x198   : > { %1057 = dma.done.wait (!%p914_p9), %s738_s19, 128  }
 0x199   : > { %1059 = vsyncadd (!%p914_p9), %s738_s19, 4294967168  ;;  %s747_s10 = scalar_lea.sflag [#allocation5], %s737_s17 }
 0x19a   : > { %1061 = dma.done.wait (!%p914_p9), %s747_s10, 128  }
 0x19b   : > { %1063 = vsyncadd (!%p914_p9), %s747_s10, 4294967168  ;;  %s24_s29 = sadd.s32 1, %s1086_s29   ;;  %s1333_s24 = smov %s1070_s25 }
 0x19c   : > { %p21_p10 = scmp.ge.s32.totalorder %s24_s29, 4   ;;  %s1334_s25 = smov %s1074_s26 }
 0x19d   : > { %s1335_s26 = smov %s1188_s14  ;;  %s1336_s27 = smov %s1082_s28 }
 0x19e   : > { %s1337_s28 = smov %s1339_s9  ;;  %23 = sbr.rel (!%p21_p10) target bundleno = 6 (0x6), region = 101 }
 0x1a5   :  { %752 = vsyncpa [#allocation3], 1 }
 0x1a6   :  { %754 = vsyncpa [#allocation3 + $0x1], 1 }
 0x1a7   :  { %755 = vsyncpa [#allocation5], 1 }
 0x1a8   :  { %757 = vsyncpa [#allocation5 + $0x1], 1 }

</bundles_post_ra>
